<compile_context>
chip_gen: v7x
topology: tpu7x:2x2x1
jax: 0.10.0
libtpu: 0.0.40
codegen_flags: <defaults>
</compile_context>

<pallas_src>
import jax
import jax.numpy as jnp
from jax import lax
from jax.experimental import pallas as pl
from jax.experimental.pallas import tpu as pltpu


def lstm_chunk_kernel(x_ref, w_ref, b_ref, scale_ref, offset_ref, h0_ref, c0_ref,
                      h_seq_ref, c_last_ref,
                      hx_state):
    """Runs `chunk` LSTM steps for one (batch_group, time_chunk) grid cell."""
    HS = c0_ref.shape[-1]
    chunk = x_ref.shape[0]
    chunk_idx = pl.program_id(1)          # time-chunk axis ("arbitrary", innermost)

    # Seed the recurrent state at the start of each batch group's sequence.
    # (weights / bias / scale / offset / h0 / c0 are VMEM-resident across the grid;
    #  c_last_ref has a constant index map along the time axis -> carried state.)
    @pl.when(chunk_idx == 0)
    def _init():
        hx_state[:, :HS] = h0_ref[...]
        c_last_ref[...] = c0_ref[...]

    def step(t, c):
        # Splice x_t into lanes [HS, HS+IN) of the resident [h | x] buffer.
        hx_state[:, HS:] = x_ref[t]
        # One fused MXU push: gates = [h|x] @ [U;W] + b  (i/f/o cols pre-scaled 0.5).
        gates = jnp.dot(hx_state[...], w_ref[...],
                        preferred_element_type=jnp.float32) + b_ref[...]
        # One full-vreg tanh covers all four gates:
        #   i/f/o lanes: sigmoid(z) = 0.5*tanh(0.5*z) + 0.5   (0.5*z already in gates)
        #   g lanes    : tanh(z)
        acts = jnp.tanh(gates) * scale_ref[...] + offset_ref[...]
        i_t = acts[:, 0 * HS:1 * HS]
        f_t = acts[:, 1 * HS:2 * HS]
        g_t = acts[:, 2 * HS:3 * HS]
        o_t = acts[:, 3 * HS:4 * HS]
        c_new = f_t * c + i_t * g_t
        h_new = o_t * jnp.tanh(c_new)
        hx_state[:, :HS] = h_new              # carry h; x-lanes rewritten next step
        h_seq_ref[t] = h_new.astype(h_seq_ref.dtype)
        return c_new

    unroll = chunk if chunk <= 16 else 8
    c_final = lax.fori_loop(0, chunk, step, c_last_ref[...], unroll=unroll)
    c_last_ref[...] = c_final                 # one c store per chunk


def _pick_chunk(T, cap=256):
    c = min(T, cap)
    while T % c:
        c -= 1
    return c


def _lstm_sequence_pallas(x_seq, h0, c0, W, U, bias):
    T, B, IN = x_seq.shape
    HS = h0.shape[-1]
    K = HS + IN
    G = 4 * HS
    f32 = jnp.float32

    chunk = _pick_chunk(T)
    num_chunks = T // chunk
    # NOTE(perf): on v7x, split a large batch into groups of >=8 rows here so the
    # leading "parallel" grid axis shards across both TensorCores; at B=8 there is
    # a single group.  Packing independent sequences into B is also how to fill
    # the MXU M dimension (>=128/256 rows) on v5e/v6e/v7x.
    Bg = B
    num_groups = B // Bg

    # --- one-time parameter prep (outside the recurrence) ---------------------
    w_all = jnp.concatenate([U, W], axis=0).astype(f32)          # (K, 4*HS), h rows first
    b2 = bias.reshape(1, G).astype(f32)
    half = jnp.full((HS,), 0.5, f32)
    one = jnp.ones((HS,), f32)
    zero = jnp.zeros((HS,), f32)
    col_pre = jnp.concatenate([half, half, one, half]).reshape(1, G)    # i,f,g,o
    scale = col_pre                                                     # 0.5/0.5/1/0.5
    offset = jnp.concatenate([half, half, zero, half]).reshape(1, G)    # 0.5/0.5/0/0.5
    w_all = w_all * col_pre          # fold the 0.5 sigmoid pre-scale into i/f/o cols
    b2 = b2 * col_pre
    # NOTE(perf): once the MXU M dim is filled, cast w_all and the [h|x] operand to
    # bf16 on v6e/v7x (keep preferred_element_type=f32); pointless at M=8.

    grid_spec = pltpu.PrefetchScalarGridSpec(
        num_scalar_prefetch=0,
        grid=(num_groups, num_chunks),
        in_specs=[
            pl.BlockSpec((chunk, Bg, IN), lambda g, c: (c, g, 0)),  # x chunk stream
            pl.BlockSpec((K, G), lambda g, c: (0, 0)),              # fused [U; W], resident
            pl.BlockSpec((1, G), lambda g, c: (0, 0)),              # bias (pre-scaled)
            pl.BlockSpec((1, G), lambda g, c: (0, 0)),              # act scale
            pl.BlockSpec((1, G), lambda g, c: (0, 0)),              # act offset
            pl.BlockSpec((Bg, HS), lambda g, c: (g, 0)),            # h0
            pl.BlockSpec((Bg, HS), lambda g, c: (g, 0)),            # c0
        ],
        out_specs=(
            pl.BlockSpec((chunk, Bg, HS), lambda g, c: (c, g, 0)),  # h_seq, 1 DMA/chunk
            pl.BlockSpec((Bg, HS), lambda g, c: (g, 0)),            # c_last = carried state
        ),
        scratch_shapes=[
            pltpu.VMEM((Bg, K), jnp.float32),   # resident [h | x] recurrent buffer
        ],
    )

    h_seq, c_last = pl.pallas_call(
        lstm_chunk_kernel,
        out_shape=(
            jax.ShapeDtypeStruct((T, B, HS), x_seq.dtype),
            jax.ShapeDtypeStruct((B, HS), jnp.float32),
        ),
        grid_spec=grid_spec,
        compiler_params=pltpu.CompilerParams(
            dimension_semantics=("parallel", "arbitrary")),
    )(x_seq.astype(f32), w_all, b2, scale, offset,
      h0.astype(f32), c0.astype(f32))
    return h_seq, c_last.astype(x_seq.dtype)


lstm_sequence_forward = jax.jit(_lstm_sequence_pallas)


def lstm_cell_forward(x_t, h_t, c_t, W, U, bias):
    """Exact equivalent of LSTMCell_un.forward (single timestep)."""
    h_seq, c_last = lstm_sequence_forward(x_t[None], h_t, c_t, W, U, bias)
    return h_seq[0], c_last


# ----------------------------- pure-JAX reference -----------------------------
def reference_cell(x_t, h_t, c_t, W, U, bias):
    HS = h_t.shape[-1]
    gates = x_t @ W + h_t @ U + bias
    i_t = jax.nn.sigmoid(gates[:, :HS])
    f_t = jax.nn.sigmoid(gates[:, HS:2 * HS])
    g_t = jnp.tanh(gates[:, 2 * HS:3 * HS])
    o_t = jax.nn.sigmoid(gates[:, 3 * HS:])
    c_new = f_t * c_t + i_t * g_t
    h_new = o_t * jnp.tanh(c_new)
    return h_new, c_new


def reference_sequence(x_seq, h0, c0, W, U, bias):
    def step(carry, x_t):
        h, c = carry
        h, c = reference_cell(x_t, h, c, W, U, bias)
        return (h, c), h
    (h, c), hs = jax.lax.scan(step, (h0, c0), x_seq)
    return hs, h, c


if __name__ == "__main__":
    # Small shapes consistent with the module: batch=8, input_size=16, hidden=32,
    # sequence length 8 (the module's cell applied step-by-step).
    B, IN, HS, T = 8, 16, 32, 8
    dtype = jnp.float32

    key = jax.random.PRNGKey(0)
    k_w, k_u, k_b, k_x, k_h, k_c = jax.random.split(key, 6)

    # init_weights(): uniform(-stdv, stdv), stdv = 1/sqrt(hidden_size)
    stdv = 1.0 / (HS ** 0.5)
    W = jax.random.uniform(k_w, (IN, 4 * HS), dtype, -stdv, stdv)
    U = jax.random.uniform(k_u, (HS, 4 * HS), dtype, -stdv, stdv)
    bias = jax.random.uniform(k_b, (4 * HS,), dtype, -stdv, stdv)

    x_seq = jax.random.normal(k_x, (T, B, IN), dtype)
    h0 = jax.random.normal(k_h, (B, HS), dtype)
    c0 = jax.random.normal(k_c, (B, HS), dtype)

    # Fused multi-step path (primary optimized kernel).
    h_seq, c_last = lstm_sequence_forward(x_seq, h0, c0, W, U, bias)
    jax.block_until_ready((h_seq, c_last))

    hs_ref, h_ref, c_ref = reference_sequence(x_seq, h0, c0, W, U, bias)
    assert jnp.allclose(h_seq, hs_ref, atol=1e-4, rtol=1e-4)
    assert jnp.allclose(c_last, c_ref, atol=1e-4, rtol=1e-4)

    # Single-step path, matching the module's forward(x_t, h_t, c_t) exactly.
    h1, c1 = lstm_cell_forward(x_seq[0], h0, c0, W, U, bias)
    jax.block_until_ready((h1, c1))
    h1_ref, c1_ref = reference_cell(x_seq[0], h0, c0, W, U, bias)
    assert jnp.allclose(h1, h1_ref, atol=1e-4, rtol=1e-4)
    assert jnp.allclose(c1, c1_ref, atol=1e-4, rtol=1e-4)

    print("KERNEL_OK")
</pallas_src>

<mosaic_0001>
module attributes {stable_mosaic.version = 11 : i64} {
  func.func @lstm_chunk_kernel(%arg0: i32, %arg1: i32, %arg2: memref<8x8x16xf32, #tpu.memory_space<vmem>>, %arg3: memref<48x128xf32, #tpu.memory_space<vmem>>, %arg4: memref<1x128xf32, #tpu.memory_space<vmem>>, %arg5: memref<1x128xf32, #tpu.memory_space<vmem>>, %arg6: memref<1x128xf32, #tpu.memory_space<vmem>>, %arg7: memref<8x32xf32, #tpu.memory_space<vmem>>, %arg8: memref<8x32xf32, #tpu.memory_space<vmem>>, %arg9: memref<8x8x32xf32, #tpu.memory_space<vmem>>, %arg10: memref<8x32xf32, #tpu.memory_space<vmem>>, %arg11: memref<8x48xf32, #tpu.memory_space<vmem>>) attributes {dimension_semantics = [#tpu.dimension_semantics<parallel>, #tpu.dimension_semantics<arbitrary>], iteration_bounds = array<i64: 1, 1>, scalar_prefetch = 0 : i64, scratch_operands = 1 : i64, tpu.core_type = #tpu.core_type<tc>, window_params = [{transform_indices = @transform_0, window_bounds = array<i64: 8, 8, 16>}, {pipeline_mode = #tpu.pipeline_mode<synchronous>, transform_indices = @transform_1, window_bounds = array<i64: 48, 128>}, {pipeline_mode = #tpu.pipeline_mode<synchronous>, transform_indices = @transform_2, window_bounds = array<i64: 1, 128>}, {pipeline_mode = #tpu.pipeline_mode<synchronous>, transform_indices = @transform_3, window_bounds = array<i64: 1, 128>}, {pipeline_mode = #tpu.pipeline_mode<synchronous>, transform_indices = @transform_4, window_bounds = array<i64: 1, 128>}, {transform_indices = @transform_5, window_bounds = array<i64: 8, 32>}, {transform_indices = @transform_6, window_bounds = array<i64: 8, 32>}, {transform_indices = @transform_7, window_bounds = array<i64: 8, 8, 32>}, {transform_indices = @transform_8, window_bounds = array<i64: 8, 32>}]} {
    %c0_i32 = arith.constant 0 : i32
    %0 = arith.cmpi eq, %arg1, %c0_i32 : i32
    %1 = arith.extui %0 : i1 to i32
    %c0_i32_0 = arith.constant 0 : i32
    %2 = arith.cmpi ne, %1, %c0_i32_0 : i32
    scf.if %2 {
      %c0_155 = arith.constant 0 : index
      %c0_156 = arith.constant 0 : index
      %253 = vector.load %arg7[%c0_155, %c0_156] : memref<8x32xf32, #tpu.memory_space<vmem>>, vector<8x32xf32>
      %c0_157 = arith.constant 0 : index
      %c0_158 = arith.constant 0 : index
      %254 = vector.load %arg11[%c0_157, %c0_158] : memref<8x48xf32, #tpu.memory_space<vmem>>, vector<8x32xf32>
      tpu.vector_store %arg11[%c0_157, %c0_158], %253 {strides = array<i32>} : memref<8x48xf32, #tpu.memory_space<vmem>>, vector<8x32xf32>,
      %c0_159 = arith.constant 0 : index
      %c0_160 = arith.constant 0 : index
      %255 = vector.load %arg8[%c0_159, %c0_160] : memref<8x32xf32, #tpu.memory_space<vmem>>, vector<8x32xf32>
      %c0_161 = arith.constant 0 : index
      %c0_162 = arith.constant 0 : index
      %256 = vector.load %arg10[%c0_161, %c0_162] : memref<8x32xf32, #tpu.memory_space<vmem>>, vector<8x32xf32>
      tpu.vector_store %arg10[%c0_161, %c0_162], %255 {strides = array<i32>} : memref<8x32xf32, #tpu.memory_space<vmem>>, vector<8x32xf32>,
    } else {
    }
    %c0 = arith.constant 0 : index
    %c0_1 = arith.constant 0 : index
    %3 = vector.load %arg10[%c0, %c0_1] : memref<8x32xf32, #tpu.memory_space<vmem>>, vector<8x32xf32>
    %c0_i32_2 = arith.constant 0 : i32
    %4 = arith.index_cast %c0_i32_2 : i32 to index
    %c0_3 = arith.constant 0 : index
    %c0_4 = arith.constant 0 : index
    %5 = vector.load %arg2[%4, %c0_3, %c0_4] : memref<8x8x16xf32, #tpu.memory_space<vmem>>, vector<1x8x16xf32>
    %6 = vector.shape_cast %5 : vector<1x8x16xf32> to vector<8x16xf32>
    %c0_5 = arith.constant 0 : index
    %c32 = arith.constant 32 : index
    %7 = vector.load %arg11[%c0_5, %c32] : memref<8x48xf32, #tpu.memory_space<vmem>>, vector<8x16xf32>
    tpu.vector_store %arg11[%c0_5, %c32], %6 {strides = array<i32>} : memref<8x48xf32, #tpu.memory_space<vmem>>, vector<8x16xf32>,
    %c0_6 = arith.constant 0 : index
    %c0_7 = arith.constant 0 : index
    %8 = vector.load %arg11[%c0_6, %c0_7] : memref<8x48xf32, #tpu.memory_space<vmem>>, vector<8x48xf32>
    %c0_8 = arith.constant 0 : index
    %c0_9 = arith.constant 0 : index
    %9 = vector.load %arg3[%c0_8, %c0_9] : memref<48x128xf32, #tpu.memory_space<vmem>>, vector<48x128xf32>
    %cst = arith.constant dense<0.000000e+00> : vector<8x128xf32>
    %10 = tpu.matmul %8, %9, %cst {dimension_numbers = #tpu.dot_dimension_numbers<[1], [0], [0], [1], [0, 0, 1, 1], [], []>} : vector<8x48xf32>, vector<48x128xf32>, vector<8x128xf32> -> vector<8x128xf32>
    %c0_10 = arith.constant 0 : index
    %c0_11 = arith.constant 0 : index
    %11 = vector.load %arg4[%c0_10, %c0_11] : memref<1x128xf32, #tpu.memory_space<vmem>>, vector<1x128xf32>
    %12 = vector.broadcast %11 : vector<1x128xf32> to vector<8x128xf32>
    %13 = arith.addf %10, %12 : vector<8x128xf32>
    %14 = math.tanh %13 : vector<8x128xf32>
    %c0_12 = arith.constant 0 : index
    %c0_13 = arith.constant 0 : index
    %15 = vector.load %arg5[%c0_12, %c0_13] : memref<1x128xf32, #tpu.memory_space<vmem>>, vector<1x128xf32>
    %16 = vector.broadcast %15 : vector<1x128xf32> to vector<8x128xf32>
    %17 = arith.mulf %14, %16 : vector<8x128xf32>
    %c0_14 = arith.constant 0 : index
    %c0_15 = arith.constant 0 : index
    %18 = vector.load %arg6[%c0_14, %c0_15] : memref<1x128xf32, #tpu.memory_space<vmem>>, vector<1x128xf32>
    %19 = vector.broadcast %18 : vector<1x128xf32> to vector<8x128xf32>
    %20 = arith.addf %17, %19 : vector<8x128xf32>
    %21 = vector.extract_strided_slice %20 {offsets = [0, 0], sizes = [8, 32], strides = [1, 1]} : vector<8x128xf32> to vector<8x32xf32>
    %22 = vector.extract_strided_slice %20 {offsets = [0, 32], sizes = [8, 32], strides = [1, 1]} : vector<8x128xf32> to vector<8x32xf32>
    %23 = vector.extract_strided_slice %20 {offsets = [0, 64], sizes = [8, 32], strides = [1, 1]} : vector<8x128xf32> to vector<8x32xf32>
    %24 = vector.extract_strided_slice %20 {offsets = [0, 96], sizes = [8, 32], strides = [1, 1]} : vector<8x128xf32> to vector<8x32xf32>
    %25 = arith.mulf %22, %3 : vector<8x32xf32>
    %26 = arith.mulf %21, %23 : vector<8x32xf32>
    %27 = arith.addf %25, %26 : vector<8x32xf32>
    %28 = math.tanh %27 : vector<8x32xf32>
    %29 = arith.mulf %24, %28 : vector<8x32xf32>
    %c0_16 = arith.constant 0 : index
    %c0_17 = arith.constant 0 : index
    %30 = vector.load %arg11[%c0_16, %c0_17] : memref<8x48xf32, #tpu.memory_space<vmem>>, vector<8x32xf32>
    tpu.vector_store %arg11[%c0_16, %c0_17], %29 {strides = array<i32>} : memref<8x48xf32, #tpu.memory_space<vmem>>, vector<8x32xf32>,
    %31 = arith.index_cast %c0_i32_2 : i32 to index
    %c0_18 = arith.constant 0 : index
    %c0_19 = arith.constant 0 : index
    %32 = vector.load %arg9[%31, %c0_18, %c0_19] : memref<8x8x32xf32, #tpu.memory_space<vmem>>, vector<1x8x32xf32>
    %33 = vector.shape_cast %32 : vector<1x8x32xf32> to vector<8x32xf32>
    %34 = vector.shape_cast %29 : vector<8x32xf32> to vector<1x8x32xf32>
    tpu.vector_store %arg9[%31, %c0_18, %c0_19], %34 {strides = array<i32>} : memref<8x8x32xf32, #tpu.memory_space<vmem>>, vector<1x8x32xf32>,
    %c1_i32 = arith.constant 1 : i32
    %35 = arith.index_cast %c1_i32 : i32 to index
    %c0_20 = arith.constant 0 : index
    %c0_21 = arith.constant 0 : index
    %36 = vector.load %arg2[%35, %c0_20, %c0_21] : memref<8x8x16xf32, #tpu.memory_space<vmem>>, vector<1x8x16xf32>
    %37 = vector.shape_cast %36 : vector<1x8x16xf32> to vector<8x16xf32>
    %c0_22 = arith.constant 0 : index
    %c32_23 = arith.constant 32 : index
    %38 = vector.load %arg11[%c0_22, %c32_23] : memref<8x48xf32, #tpu.memory_space<vmem>>, vector<8x16xf32>
    tpu.vector_store %arg11[%c0_22, %c32_23], %37 {strides = array<i32>} : memref<8x48xf32, #tpu.memory_space<vmem>>, vector<8x16xf32>,
    %c0_24 = arith.constant 0 : index
    %c0_25 = arith.constant 0 : index
    %39 = vector.load %arg11[%c0_24, %c0_25] : memref<8x48xf32, #tpu.memory_space<vmem>>, vector<8x48xf32>
    %c0_26 = arith.constant 0 : index
    %c0_27 = arith.constant 0 : index
    %40 = vector.load %arg3[%c0_26, %c0_27] : memref<48x128xf32, #tpu.memory_space<vmem>>, vector<48x128xf32>
    %cst_28 = arith.constant dense<0.000000e+00> : vector<8x128xf32>
    %41 = tpu.matmul %39, %40, %cst_28 {dimension_numbers = #tpu.dot_dimension_numbers<[1], [0], [0], [1], [0, 0, 1, 1], [], []>} : vector<8x48xf32>, vector<48x128xf32>, vector<8x128xf32> -> vector<8x128xf32>
    %c0_29 = arith.constant 0 : index
    %c0_30 = arith.constant 0 : index
    %42 = vector.load %arg4[%c0_29, %c0_30] : memref<1x128xf32, #tpu.memory_space<vmem>>, vector<1x128xf32>
    %43 = vector.broadcast %42 : vector<1x128xf32> to vector<8x128xf32>
    %44 = arith.addf %41, %43 : vector<8x128xf32>
    %45 = math.tanh %44 : vector<8x128xf32>
    %c0_31 = arith.constant 0 : index
    %c0_32 = arith.constant 0 : index
    %46 = vector.load %arg5[%c0_31, %c0_32] : memref<1x128xf32, #tpu.memory_space<vmem>>, vector<1x128xf32>
    %47 = vector.broadcast %46 : vector<1x128xf32> to vector<8x128xf32>
    %48 = arith.mulf %45, %47 : vector<8x128xf32>
    %c0_33 = arith.constant 0 : index
    %c0_34 = arith.constant 0 : index
    %49 = vector.load %arg6[%c0_33, %c0_34] : memref<1x128xf32, #tpu.memory_space<vmem>>, vector<1x128xf32>
    %50 = vector.broadcast %49 : vector<1x128xf32> to vector<8x128xf32>
    %51 = arith.addf %48, %50 : vector<8x128xf32>
    %52 = vector.extract_strided_slice %51 {offsets = [0, 0], sizes = [8, 32], strides = [1, 1]} : vector<8x128xf32> to vector<8x32xf32>
    %53 = vector.extract_strided_slice %51 {offsets = [0, 32], sizes = [8, 32], strides = [1, 1]} : vector<8x128xf32> to vector<8x32xf32>
    %54 = vector.extract_strided_slice %51 {offsets = [0, 64], sizes = [8, 32], strides = [1, 1]} : vector<8x128xf32> to vector<8x32xf32>
    %55 = vector.extract_strided_slice %51 {offsets = [0, 96], sizes = [8, 32], strides = [1, 1]} : vector<8x128xf32> to vector<8x32xf32>
    %56 = arith.mulf %53, %27 : vector<8x32xf32>
    %57 = arith.mulf %52, %54 : vector<8x32xf32>
    %58 = arith.addf %56, %57 : vector<8x32xf32>
    %59 = math.tanh %58 : vector<8x32xf32>
    %60 = arith.mulf %55, %59 : vector<8x32xf32>
    %c0_35 = arith.constant 0 : index
    %c0_36 = arith.constant 0 : index
    %61 = vector.load %arg11[%c0_35, %c0_36] : memref<8x48xf32, #tpu.memory_space<vmem>>, vector<8x32xf32>
    tpu.vector_store %arg11[%c0_35, %c0_36], %60 {strides = array<i32>} : memref<8x48xf32, #tpu.memory_space<vmem>>, vector<8x32xf32>,
    %62 = arith.index_cast %c1_i32 : i32 to index
    %c0_37 = arith.constant 0 : index
    %c0_38 = arith.constant 0 : index
    %63 = vector.load %arg9[%62, %c0_37, %c0_38] : memref<8x8x32xf32, #tpu.memory_space<vmem>>, vector<1x8x32xf32>
    %64 = vector.shape_cast %63 : vector<1x8x32xf32> to vector<8x32xf32>
    %65 = vector.shape_cast %60 : vector<8x32xf32> to vector<1x8x32xf32>
    tpu.vector_store %arg9[%62, %c0_37, %c0_38], %65 {strides = array<i32>} : memref<8x8x32xf32, #tpu.memory_space<vmem>>, vector<1x8x32xf32>,
    %c2_i32 = arith.constant 2 : i32
    %66 = arith.index_cast %c2_i32 : i32 to index
    %c0_39 = arith.constant 0 : index
    %c0_40 = arith.constant 0 : index
    %67 = vector.load %arg2[%66, %c0_39, %c0_40] : memref<8x8x16xf32, #tpu.memory_space<vmem>>, vector<1x8x16xf32>
    %68 = vector.shape_cast %67 : vector<1x8x16xf32> to vector<8x16xf32>
    %c0_41 = arith.constant 0 : index
    %c32_42 = arith.constant 32 : index
    %69 = vector.load %arg11[%c0_41, %c32_42] : memref<8x48xf32, #tpu.memory_space<vmem>>, vector<8x16xf32>
    tpu.vector_store %arg11[%c0_41, %c32_42], %68 {strides = array<i32>} : memref<8x48xf32, #tpu.memory_space<vmem>>, vector<8x16xf32>,
    %c0_43 = arith.constant 0 : index
    %c0_44 = arith.constant 0 : index
    %70 = vector.load %arg11[%c0_43, %c0_44] : memref<8x48xf32, #tpu.memory_space<vmem>>, vector<8x48xf32>
    %c0_45 = arith.constant 0 : index
    %c0_46 = arith.constant 0 : index
    %71 = vector.load %arg3[%c0_45, %c0_46] : memref<48x128xf32, #tpu.memory_space<vmem>>, vector<48x128xf32>
    %cst_47 = arith.constant dense<0.000000e+00> : vector<8x128xf32>
    %72 = tpu.matmul %70, %71, %cst_47 {dimension_numbers = #tpu.dot_dimension_numbers<[1], [0], [0], [1], [0, 0, 1, 1], [], []>} : vector<8x48xf32>, vector<48x128xf32>, vector<8x128xf32> -> vector<8x128xf32>
    %c0_48 = arith.constant 0 : index
    %c0_49 = arith.constant 0 : index
    %73 = vector.load %arg4[%c0_48, %c0_49] : memref<1x128xf32, #tpu.memory_space<vmem>>, vector<1x128xf32>
    %74 = vector.broadcast %73 : vector<1x128xf32> to vector<8x128xf32>
    %75 = arith.addf %72, %74 : vector<8x128xf32>
    %76 = math.tanh %75 : vector<8x128xf32>
    %c0_50 = arith.constant 0 : index
    %c0_51 = arith.constant 0 : index
    %77 = vector.load %arg5[%c0_50, %c0_51] : memref<1x128xf32, #tpu.memory_space<vmem>>, vector<1x128xf32>
    %78 = vector.broadcast %77 : vector<1x128xf32> to vector<8x128xf32>
    %79 = arith.mulf %76, %78 : vector<8x128xf32>
    %c0_52 = arith.constant 0 : index
    %c0_53 = arith.constant 0 : index
    %80 = vector.load %arg6[%c0_52, %c0_53] : memref<1x128xf32, #tpu.memory_space<vmem>>, vector<1x128xf32>
    %81 = vector.broadcast %80 : vector<1x128xf32> to vector<8x128xf32>
    %82 = arith.addf %79, %81 : vector<8x128xf32>
    %83 = vector.extract_strided_slice %82 {offsets = [0, 0], sizes = [8, 32], strides = [1, 1]} : vector<8x128xf32> to vector<8x32xf32>
    %84 = vector.extract_strided_slice %82 {offsets = [0, 32], sizes = [8, 32], strides = [1, 1]} : vector<8x128xf32> to vector<8x32xf32>
    %85 = vector.extract_strided_slice %82 {offsets = [0, 64], sizes = [8, 32], strides = [1, 1]} : vector<8x128xf32> to vector<8x32xf32>
    %86 = vector.extract_strided_slice %82 {offsets = [0, 96], sizes = [8, 32], strides = [1, 1]} : vector<8x128xf32> to vector<8x32xf32>
    %87 = arith.mulf %84, %58 : vector<8x32xf32>
    %88 = arith.mulf %83, %85 : vector<8x32xf32>
    %89 = arith.addf %87, %88 : vector<8x32xf32>
    %90 = math.tanh %89 : vector<8x32xf32>
    %91 = arith.mulf %86, %90 : vector<8x32xf32>
    %c0_54 = arith.constant 0 : index
    %c0_55 = arith.constant 0 : index
    %92 = vector.load %arg11[%c0_54, %c0_55] : memref<8x48xf32, #tpu.memory_space<vmem>>, vector<8x32xf32>
    tpu.vector_store %arg11[%c0_54, %c0_55], %91 {strides = array<i32>} : memref<8x48xf32, #tpu.memory_space<vmem>>, vector<8x32xf32>,
    %93 = arith.index_cast %c2_i32 : i32 to index
    %c0_56 = arith.constant 0 : index
    %c0_57 = arith.constant 0 : index
    %94 = vector.load %arg9[%93, %c0_56, %c0_57] : memref<8x8x32xf32, #tpu.memory_space<vmem>>, vector<1x8x32xf32>
    %95 = vector.shape_cast %94 : vector<1x8x32xf32> to vector<8x32xf32>
    %96 = vector.shape_cast %91 : vector<8x32xf32> to vector<1x8x32xf32>
    tpu.vector_store %arg9[%93, %c0_56, %c0_57], %96 {strides = array<i32>} : memref<8x8x32xf32, #tpu.memory_space<vmem>>, vector<1x8x32xf32>,
    %c3_i32 = arith.constant 3 : i32
    %97 = arith.index_cast %c3_i32 : i32 to index
    %c0_58 = arith.constant 0 : index
    %c0_59 = arith.constant 0 : index
    %98 = vector.load %arg2[%97, %c0_58, %c0_59] : memref<8x8x16xf32, #tpu.memory_space<vmem>>, vector<1x8x16xf32>
    %99 = vector.shape_cast %98 : vector<1x8x16xf32> to vector<8x16xf32>
    %c0_60 = arith.constant 0 : index
    %c32_61 = arith.constant 32 : index
    %100 = vector.load %arg11[%c0_60, %c32_61] : memref<8x48xf32, #tpu.memory_space<vmem>>, vector<8x16xf32>
    tpu.vector_store %arg11[%c0_60, %c32_61], %99 {strides = array<i32>} : memref<8x48xf32, #tpu.memory_space<vmem>>, vector<8x16xf32>,
    %c0_62 = arith.constant 0 : index
    %c0_63 = arith.constant 0 : index
    %101 = vector.load %arg11[%c0_62, %c0_63] : memref<8x48xf32, #tpu.memory_space<vmem>>, vector<8x48xf32>
    %c0_64 = arith.constant 0 : index
    %c0_65 = arith.constant 0 : index
    %102 = vector.load %arg3[%c0_64, %c0_65] : memref<48x128xf32, #tpu.memory_space<vmem>>, vector<48x128xf32>
    %cst_66 = arith.constant dense<0.000000e+00> : vector<8x128xf32>
    %103 = tpu.matmul %101, %102, %cst_66 {dimension_numbers = #tpu.dot_dimension_numbers<[1], [0], [0], [1], [0, 0, 1, 1], [], []>} : vector<8x48xf32>, vector<48x128xf32>, vector<8x128xf32> -> vector<8x128xf32>
    %c0_67 = arith.constant 0 : index
    %c0_68 = arith.constant 0 : index
    %104 = vector.load %arg4[%c0_67, %c0_68] : memref<1x128xf32, #tpu.memory_space<vmem>>, vector<1x128xf32>
    %105 = vector.broadcast %104 : vector<1x128xf32> to vector<8x128xf32>
    %106 = arith.addf %103, %105 : vector<8x128xf32>
    %107 = math.tanh %106 : vector<8x128xf32>
    %c0_69 = arith.constant 0 : index
    %c0_70 = arith.constant 0 : index
    %108 = vector.load %arg5[%c0_69, %c0_70] : memref<1x128xf32, #tpu.memory_space<vmem>>, vector<1x128xf32>
    %109 = vector.broadcast %108 : vector<1x128xf32> to vector<8x128xf32>
    %110 = arith.mulf %107, %109 : vector<8x128xf32>
    %c0_71 = arith.constant 0 : index
    %c0_72 = arith.constant 0 : index
    %111 = vector.load %arg6[%c0_71, %c0_72] : memref<1x128xf32, #tpu.memory_space<vmem>>, vector<1x128xf32>
    %112 = vector.broadcast %111 : vector<1x128xf32> to vector<8x128xf32>
    %113 = arith.addf %110, %112 : vector<8x128xf32>
    %114 = vector.extract_strided_slice %113 {offsets = [0, 0], sizes = [8, 32], strides = [1, 1]} : vector<8x128xf32> to vector<8x32xf32>
    %115 = vector.extract_strided_slice %113 {offsets = [0, 32], sizes = [8, 32], strides = [1, 1]} : vector<8x128xf32> to vector<8x32xf32>
    %116 = vector.extract_strided_slice %113 {offsets = [0, 64], sizes = [8, 32], strides = [1, 1]} : vector<8x128xf32> to vector<8x32xf32>
    %117 = vector.extract_strided_slice %113 {offsets = [0, 96], sizes = [8, 32], strides = [1, 1]} : vector<8x128xf32> to vector<8x32xf32>
    %118 = arith.mulf %115, %89 : vector<8x32xf32>
    %119 = arith.mulf %114, %116 : vector<8x32xf32>
    %120 = arith.addf %118, %119 : vector<8x32xf32>
    %121 = math.tanh %120 : vector<8x32xf32>
    %122 = arith.mulf %117, %121 : vector<8x32xf32>
    %c0_73 = arith.constant 0 : index
    %c0_74 = arith.constant 0 : index
    %123 = vector.load %arg11[%c0_73, %c0_74] : memref<8x48xf32, #tpu.memory_space<vmem>>, vector<8x32xf32>
    tpu.vector_store %arg11[%c0_73, %c0_74], %122 {strides = array<i32>} : memref<8x48xf32, #tpu.memory_space<vmem>>, vector<8x32xf32>,
    %124 = arith.index_cast %c3_i32 : i32 to index
    %c0_75 = arith.constant 0 : index
    %c0_76 = arith.constant 0 : index
    %125 = vector.load %arg9[%124, %c0_75, %c0_76] : memref<8x8x32xf32, #tpu.memory_space<vmem>>, vector<1x8x32xf32>
    %126 = vector.shape_cast %125 : vector<1x8x32xf32> to vector<8x32xf32>
    %127 = vector.shape_cast %122 : vector<8x32xf32> to vector<1x8x32xf32>
    tpu.vector_store %arg9[%124, %c0_75, %c0_76], %127 {strides = array<i32>} : memref<8x8x32xf32, #tpu.memory_space<vmem>>, vector<1x8x32xf32>,
    %c4_i32 = arith.constant 4 : i32
    %128 = arith.index_cast %c4_i32 : i32 to index
    %c0_77 = arith.constant 0 : index
    %c0_78 = arith.constant 0 : index
    %129 = vector.load %arg2[%128, %c0_77, %c0_78] : memref<8x8x16xf32, #tpu.memory_space<vmem>>, vector<1x8x16xf32>
    %130 = vector.shape_cast %129 : vector<1x8x16xf32> to vector<8x16xf32>
    %c0_79 = arith.constant 0 : index
    %c32_80 = arith.constant 32 : index
    %131 = vector.load %arg11[%c0_79, %c32_80] : memref<8x48xf32, #tpu.memory_space<vmem>>, vector<8x16xf32>
    tpu.vector_store %arg11[%c0_79, %c32_80], %130 {strides = array<i32>} : memref<8x48xf32, #tpu.memory_space<vmem>>, vector<8x16xf32>,
    %c0_81 = arith.constant 0 : index
    %c0_82 = arith.constant 0 : index
    %132 = vector.load %arg11[%c0_81, %c0_82] : memref<8x48xf32, #tpu.memory_space<vmem>>, vector<8x48xf32>
    %c0_83 = arith.constant 0 : index
    %c0_84 = arith.constant 0 : index
    %133 = vector.load %arg3[%c0_83, %c0_84] : memref<48x128xf32, #tpu.memory_space<vmem>>, vector<48x128xf32>
    %cst_85 = arith.constant dense<0.000000e+00> : vector<8x128xf32>
    %134 = tpu.matmul %132, %133, %cst_85 {dimension_numbers = #tpu.dot_dimension_numbers<[1], [0], [0], [1], [0, 0, 1, 1], [], []>} : vector<8x48xf32>, vector<48x128xf32>, vector<8x128xf32> -> vector<8x128xf32>
    %c0_86 = arith.constant 0 : index
    %c0_87 = arith.constant 0 : index
    %135 = vector.load %arg4[%c0_86, %c0_87] : memref<1x128xf32, #tpu.memory_space<vmem>>, vector<1x128xf32>
    %136 = vector.broadcast %135 : vector<1x128xf32> to vector<8x128xf32>
    %137 = arith.addf %134, %136 : vector<8x128xf32>
    %138 = math.tanh %137 : vector<8x128xf32>
    %c0_88 = arith.constant 0 : index
    %c0_89 = arith.constant 0 : index
    %139 = vector.load %arg5[%c0_88, %c0_89] : memref<1x128xf32, #tpu.memory_space<vmem>>, vector<1x128xf32>
    %140 = vector.broadcast %139 : vector<1x128xf32> to vector<8x128xf32>
    %141 = arith.mulf %138, %140 : vector<8x128xf32>
    %c0_90 = arith.constant 0 : index
    %c0_91 = arith.constant 0 : index
    %142 = vector.load %arg6[%c0_90, %c0_91] : memref<1x128xf32, #tpu.memory_space<vmem>>, vector<1x128xf32>
    %143 = vector.broadcast %142 : vector<1x128xf32> to vector<8x128xf32>
    %144 = arith.addf %141, %143 : vector<8x128xf32>
    %145 = vector.extract_strided_slice %144 {offsets = [0, 0], sizes = [8, 32], strides = [1, 1]} : vector<8x128xf32> to vector<8x32xf32>
    %146 = vector.extract_strided_slice %144 {offsets = [0, 32], sizes = [8, 32], strides = [1, 1]} : vector<8x128xf32> to vector<8x32xf32>
    %147 = vector.extract_strided_slice %144 {offsets = [0, 64], sizes = [8, 32], strides = [1, 1]} : vector<8x128xf32> to vector<8x32xf32>
    %148 = vector.extract_strided_slice %144 {offsets = [0, 96], sizes = [8, 32], strides = [1, 1]} : vector<8x128xf32> to vector<8x32xf32>
    %149 = arith.mulf %146, %120 : vector<8x32xf32>
    %150 = arith.mulf %145, %147 : vector<8x32xf32>
    %151 = arith.addf %149, %150 : vector<8x32xf32>
    %152 = math.tanh %151 : vector<8x32xf32>
    %153 = arith.mulf %148, %152 : vector<8x32xf32>
    %c0_92 = arith.constant 0 : index
    %c0_93 = arith.constant 0 : index
    %154 = vector.load %arg11[%c0_92, %c0_93] : memref<8x48xf32, #tpu.memory_space<vmem>>, vector<8x32xf32>
    tpu.vector_store %arg11[%c0_92, %c0_93], %153 {strides = array<i32>} : memref<8x48xf32, #tpu.memory_space<vmem>>, vector<8x32xf32>,
    %155 = arith.index_cast %c4_i32 : i32 to index
    %c0_94 = arith.constant 0 : index
    %c0_95 = arith.constant 0 : index
    %156 = vector.load %arg9[%155, %c0_94, %c0_95] : memref<8x8x32xf32, #tpu.memory_space<vmem>>, vector<1x8x32xf32>
    %157 = vector.shape_cast %156 : vector<1x8x32xf32> to vector<8x32xf32>
    %158 = vector.shape_cast %153 : vector<8x32xf32> to vector<1x8x32xf32>
    tpu.vector_store %arg9[%155, %c0_94, %c0_95], %158 {strides = array<i32>} : memref<8x8x32xf32, #tpu.memory_space<vmem>>, vector<1x8x32xf32>,
    %c5_i32 = arith.constant 5 : i32
    %159 = arith.index_cast %c5_i32 : i32 to index
    %c0_96 = arith.constant 0 : index
    %c0_97 = arith.constant 0 : index
    %160 = vector.load %arg2[%159, %c0_96, %c0_97] : memref<8x8x16xf32, #tpu.memory_space<vmem>>, vector<1x8x16xf32>
    %161 = vector.shape_cast %160 : vector<1x8x16xf32> to vector<8x16xf32>
    %c0_98 = arith.constant 0 : index
    %c32_99 = arith.constant 32 : index
    %162 = vector.load %arg11[%c0_98, %c32_99] : memref<8x48xf32, #tpu.memory_space<vmem>>, vector<8x16xf32>
    tpu.vector_store %arg11[%c0_98, %c32_99], %161 {strides = array<i32>} : memref<8x48xf32, #tpu.memory_space<vmem>>, vector<8x16xf32>,
    %c0_100 = arith.constant 0 : index
    %c0_101 = arith.constant 0 : index
    %163 = vector.load %arg11[%c0_100, %c0_101] : memref<8x48xf32, #tpu.memory_space<vmem>>, vector<8x48xf32>
    %c0_102 = arith.constant 0 : index
    %c0_103 = arith.constant 0 : index
    %164 = vector.load %arg3[%c0_102, %c0_103] : memref<48x128xf32, #tpu.memory_space<vmem>>, vector<48x128xf32>
    %cst_104 = arith.constant dense<0.000000e+00> : vector<8x128xf32>
    %165 = tpu.matmul %163, %164, %cst_104 {dimension_numbers = #tpu.dot_dimension_numbers<[1], [0], [0], [1], [0, 0, 1, 1], [], []>} : vector<8x48xf32>, vector<48x128xf32>, vector<8x128xf32> -> vector<8x128xf32>
    %c0_105 = arith.constant 0 : index
    %c0_106 = arith.constant 0 : index
    %166 = vector.load %arg4[%c0_105, %c0_106] : memref<1x128xf32, #tpu.memory_space<vmem>>, vector<1x128xf32>
    %167 = vector.broadcast %166 : vector<1x128xf32> to vector<8x128xf32>
    %168 = arith.addf %165, %167 : vector<8x128xf32>
    %169 = math.tanh %168 : vector<8x128xf32>
    %c0_107 = arith.constant 0 : index
    %c0_108 = arith.constant 0 : index
    %170 = vector.load %arg5[%c0_107, %c0_108] : memref<1x128xf32, #tpu.memory_space<vmem>>, vector<1x128xf32>
    %171 = vector.broadcast %170 : vector<1x128xf32> to vector<8x128xf32>
    %172 = arith.mulf %169, %171 : vector<8x128xf32>
    %c0_109 = arith.constant 0 : index
    %c0_110 = arith.constant 0 : index
    %173 = vector.load %arg6[%c0_109, %c0_110] : memref<1x128xf32, #tpu.memory_space<vmem>>, vector<1x128xf32>
    %174 = vector.broadcast %173 : vector<1x128xf32> to vector<8x128xf32>
    %175 = arith.addf %172, %174 : vector<8x128xf32>
    %176 = vector.extract_strided_slice %175 {offsets = [0, 0], sizes = [8, 32], strides = [1, 1]} : vector<8x128xf32> to vector<8x32xf32>
    %177 = vector.extract_strided_slice %175 {offsets = [0, 32], sizes = [8, 32], strides = [1, 1]} : vector<8x128xf32> to vector<8x32xf32>
    %178 = vector.extract_strided_slice %175 {offsets = [0, 64], sizes = [8, 32], strides = [1, 1]} : vector<8x128xf32> to vector<8x32xf32>
    %179 = vector.extract_strided_slice %175 {offsets = [0, 96], sizes = [8, 32], strides = [1, 1]} : vector<8x128xf32> to vector<8x32xf32>
    %180 = arith.mulf %177, %151 : vector<8x32xf32>
    %181 = arith.mulf %176, %178 : vector<8x32xf32>
    %182 = arith.addf %180, %181 : vector<8x32xf32>
    %183 = math.tanh %182 : vector<8x32xf32>
    %184 = arith.mulf %179, %183 : vector<8x32xf32>
    %c0_111 = arith.constant 0 : index
    %c0_112 = arith.constant 0 : index
    %185 = vector.load %arg11[%c0_111, %c0_112] : memref<8x48xf32, #tpu.memory_space<vmem>>, vector<8x32xf32>
    tpu.vector_store %arg11[%c0_111, %c0_112], %184 {strides = array<i32>} : memref<8x48xf32, #tpu.memory_space<vmem>>, vector<8x32xf32>,
    %186 = arith.index_cast %c5_i32 : i32 to index
    %c0_113 = arith.constant 0 : index
    %c0_114 = arith.constant 0 : index
    %187 = vector.load %arg9[%186, %c0_113, %c0_114] : memref<8x8x32xf32, #tpu.memory_space<vmem>>, vector<1x8x32xf32>
    %188 = vector.shape_cast %187 : vector<1x8x32xf32> to vector<8x32xf32>
    %189 = vector.shape_cast %184 : vector<8x32xf32> to vector<1x8x32xf32>
    tpu.vector_store %arg9[%186, %c0_113, %c0_114], %189 {strides = array<i32>} : memref<8x8x32xf32, #tpu.memory_space<vmem>>, vector<1x8x32xf32>,
    %c6_i32 = arith.constant 6 : i32
    %190 = arith.index_cast %c6_i32 : i32 to index
    %c0_115 = arith.constant 0 : index
    %c0_116 = arith.constant 0 : index
    %191 = vector.load %arg2[%190, %c0_115, %c0_116] : memref<8x8x16xf32, #tpu.memory_space<vmem>>, vector<1x8x16xf32>
    %192 = vector.shape_cast %191 : vector<1x8x16xf32> to vector<8x16xf32>
    %c0_117 = arith.constant 0 : index
    %c32_118 = arith.constant 32 : index
    %193 = vector.load %arg11[%c0_117, %c32_118] : memref<8x48xf32, #tpu.memory_space<vmem>>, vector<8x16xf32>
    tpu.vector_store %arg11[%c0_117, %c32_118], %192 {strides = array<i32>} : memref<8x48xf32, #tpu.memory_space<vmem>>, vector<8x16xf32>,
    %c0_119 = arith.constant 0 : index
    %c0_120 = arith.constant 0 : index
    %194 = vector.load %arg11[%c0_119, %c0_120] : memref<8x48xf32, #tpu.memory_space<vmem>>, vector<8x48xf32>
    %c0_121 = arith.constant 0 : index
    %c0_122 = arith.constant 0 : index
    %195 = vector.load %arg3[%c0_121, %c0_122] : memref<48x128xf32, #tpu.memory_space<vmem>>, vector<48x128xf32>
    %cst_123 = arith.constant dense<0.000000e+00> : vector<8x128xf32>
    %196 = tpu.matmul %194, %195, %cst_123 {dimension_numbers = #tpu.dot_dimension_numbers<[1], [0], [0], [1], [0, 0, 1, 1], [], []>} : vector<8x48xf32>, vector<48x128xf32>, vector<8x128xf32> -> vector<8x128xf32>
    %c0_124 = arith.constant 0 : index
    %c0_125 = arith.constant 0 : index
    %197 = vector.load %arg4[%c0_124, %c0_125] : memref<1x128xf32, #tpu.memory_space<vmem>>, vector<1x128xf32>
    %198 = vector.broadcast %197 : vector<1x128xf32> to vector<8x128xf32>
    %199 = arith.addf %196, %198 : vector<8x128xf32>
    %200 = math.tanh %199 : vector<8x128xf32>
    %c0_126 = arith.constant 0 : index
    %c0_127 = arith.constant 0 : index
    %201 = vector.load %arg5[%c0_126, %c0_127] : memref<1x128xf32, #tpu.memory_space<vmem>>, vector<1x128xf32>
    %202 = vector.broadcast %201 : vector<1x128xf32> to vector<8x128xf32>
    %203 = arith.mulf %200, %202 : vector<8x128xf32>
    %c0_128 = arith.constant 0 : index
    %c0_129 = arith.constant 0 : index
    %204 = vector.load %arg6[%c0_128, %c0_129] : memref<1x128xf32, #tpu.memory_space<vmem>>, vector<1x128xf32>
    %205 = vector.broadcast %204 : vector<1x128xf32> to vector<8x128xf32>
    %206 = arith.addf %203, %205 : vector<8x128xf32>
    %207 = vector.extract_strided_slice %206 {offsets = [0, 0], sizes = [8, 32], strides = [1, 1]} : vector<8x128xf32> to vector<8x32xf32>
    %208 = vector.extract_strided_slice %206 {offsets = [0, 32], sizes = [8, 32], strides = [1, 1]} : vector<8x128xf32> to vector<8x32xf32>
    %209 = vector.extract_strided_slice %206 {offsets = [0, 64], sizes = [8, 32], strides = [1, 1]} : vector<8x128xf32> to vector<8x32xf32>
    %210 = vector.extract_strided_slice %206 {offsets = [0, 96], sizes = [8, 32], strides = [1, 1]} : vector<8x128xf32> to vector<8x32xf32>
    %211 = arith.mulf %208, %182 : vector<8x32xf32>
    %212 = arith.mulf %207, %209 : vector<8x32xf32>
    %213 = arith.addf %211, %212 : vector<8x32xf32>
    %214 = math.tanh %213 : vector<8x32xf32>
    %215 = arith.mulf %210, %214 : vector<8x32xf32>
    %c0_130 = arith.constant 0 : index
    %c0_131 = arith.constant 0 : index
    %216 = vector.load %arg11[%c0_130, %c0_131] : memref<8x48xf32, #tpu.memory_space<vmem>>, vector<8x32xf32>
    tpu.vector_store %arg11[%c0_130, %c0_131], %215 {strides = array<i32>} : memref<8x48xf32, #tpu.memory_space<vmem>>, vector<8x32xf32>,
    %217 = arith.index_cast %c6_i32 : i32 to index
    %c0_132 = arith.constant 0 : index
    %c0_133 = arith.constant 0 : index
    %218 = vector.load %arg9[%217, %c0_132, %c0_133] : memref<8x8x32xf32, #tpu.memory_space<vmem>>, vector<1x8x32xf32>
    %219 = vector.shape_cast %218 : vector<1x8x32xf32> to vector<8x32xf32>
    %220 = vector.shape_cast %215 : vector<8x32xf32> to vector<1x8x32xf32>
    tpu.vector_store %arg9[%217, %c0_132, %c0_133], %220 {strides = array<i32>} : memref<8x8x32xf32, #tpu.memory_space<vmem>>, vector<1x8x32xf32>,
    %c7_i32 = arith.constant 7 : i32
    %221 = arith.index_cast %c7_i32 : i32 to index
    %c0_134 = arith.constant 0 : index
    %c0_135 = arith.constant 0 : index
    %222 = vector.load %arg2[%221, %c0_134, %c0_135] : memref<8x8x16xf32, #tpu.memory_space<vmem>>, vector<1x8x16xf32>
    %223 = vector.shape_cast %222 : vector<1x8x16xf32> to vector<8x16xf32>
    %c0_136 = arith.constant 0 : index
    %c32_137 = arith.constant 32 : index
    %224 = vector.load %arg11[%c0_136, %c32_137] : memref<8x48xf32, #tpu.memory_space<vmem>>, vector<8x16xf32>
    tpu.vector_store %arg11[%c0_136, %c32_137], %223 {strides = array<i32>} : memref<8x48xf32, #tpu.memory_space<vmem>>, vector<8x16xf32>,
    %c0_138 = arith.constant 0 : index
    %c0_139 = arith.constant 0 : index
    %225 = vector.load %arg11[%c0_138, %c0_139] : memref<8x48xf32, #tpu.memory_space<vmem>>, vector<8x48xf32>
    %c0_140 = arith.constant 0 : index
    %c0_141 = arith.constant 0 : index
    %226 = vector.load %arg3[%c0_140, %c0_141] : memref<48x128xf32, #tpu.memory_space<vmem>>, vector<48x128xf32>
    %cst_142 = arith.constant dense<0.000000e+00> : vector<8x128xf32>
    %227 = tpu.matmul %225, %226, %cst_142 {dimension_numbers = #tpu.dot_dimension_numbers<[1], [0], [0], [1], [0, 0, 1, 1], [], []>} : vector<8x48xf32>, vector<48x128xf32>, vector<8x128xf32> -> vector<8x128xf32>
    %c0_143 = arith.constant 0 : index
    %c0_144 = arith.constant 0 : index
    %228 = vector.load %arg4[%c0_143, %c0_144] : memref<1x128xf32, #tpu.memory_space<vmem>>, vector<1x128xf32>
    %229 = vector.broadcast %228 : vector<1x128xf32> to vector<8x128xf32>
    %230 = arith.addf %227, %229 : vector<8x128xf32>
    %231 = math.tanh %230 : vector<8x128xf32>
    %c0_145 = arith.constant 0 : index
    %c0_146 = arith.constant 0 : index
    %232 = vector.load %arg5[%c0_145, %c0_146] : memref<1x128xf32, #tpu.memory_space<vmem>>, vector<1x128xf32>
    %233 = vector.broadcast %232 : vector<1x128xf32> to vector<8x128xf32>
    %234 = arith.mulf %231, %233 : vector<8x128xf32>
    %c0_147 = arith.constant 0 : index
    %c0_148 = arith.constant 0 : index
    %235 = vector.load %arg6[%c0_147, %c0_148] : memref<1x128xf32, #tpu.memory_space<vmem>>, vector<1x128xf32>
    %236 = vector.broadcast %235 : vector<1x128xf32> to vector<8x128xf32>
    %237 = arith.addf %234, %236 : vector<8x128xf32>
    %238 = vector.extract_strided_slice %237 {offsets = [0, 0], sizes = [8, 32], strides = [1, 1]} : vector<8x128xf32> to vector<8x32xf32>
    %239 = vector.extract_strided_slice %237 {offsets = [0, 32], sizes = [8, 32], strides = [1, 1]} : vector<8x128xf32> to vector<8x32xf32>
    %240 = vector.extract_strided_slice %237 {offsets = [0, 64], sizes = [8, 32], strides = [1, 1]} : vector<8x128xf32> to vector<8x32xf32>
    %241 = vector.extract_strided_slice %237 {offsets = [0, 96], sizes = [8, 32], strides = [1, 1]} : vector<8x128xf32> to vector<8x32xf32>
    %242 = arith.mulf %239, %213 : vector<8x32xf32>
    %243 = arith.mulf %238, %240 : vector<8x32xf32>
    %244 = arith.addf %242, %243 : vector<8x32xf32>
    %245 = math.tanh %244 : vector<8x32xf32>
    %246 = arith.mulf %241, %245 : vector<8x32xf32>
    %c0_149 = arith.constant 0 : index
    %c0_150 = arith.constant 0 : index
    %247 = vector.load %arg11[%c0_149, %c0_150] : memref<8x48xf32, #tpu.memory_space<vmem>>, vector<8x32xf32>
    tpu.vector_store %arg11[%c0_149, %c0_150], %246 {strides = array<i32>} : memref<8x48xf32, #tpu.memory_space<vmem>>, vector<8x32xf32>,
    %248 = arith.index_cast %c7_i32 : i32 to index
    %c0_151 = arith.constant 0 : index
    %c0_152 = arith.constant 0 : index
    %249 = vector.load %arg9[%248, %c0_151, %c0_152] : memref<8x8x32xf32, #tpu.memory_space<vmem>>, vector<1x8x32xf32>
    %250 = vector.shape_cast %249 : vector<1x8x32xf32> to vector<8x32xf32>
    %251 = vector.shape_cast %246 : vector<8x32xf32> to vector<1x8x32xf32>
    tpu.vector_store %arg9[%248, %c0_151, %c0_152], %251 {strides = array<i32>} : memref<8x8x32xf32, #tpu.memory_space<vmem>>, vector<1x8x32xf32>,
    %c8_i32 = arith.constant 8 : i32
    %c0_153 = arith.constant 0 : index
    %c0_154 = arith.constant 0 : index
    %252 = vector.load %arg10[%c0_153, %c0_154] : memref<8x32xf32, #tpu.memory_space<vmem>>, vector<8x32xf32>
    tpu.vector_store %arg10[%c0_153, %c0_154], %244 {strides = array<i32>} : memref<8x32xf32, #tpu.memory_space<vmem>>, vector<8x32xf32>,
    return
  }
  func.func @transform_0(%arg0: i32, %arg1: i32) -> (i32, i32, i32) {
    %c0_i32 = arith.constant 0 : i32
    %c0_i32_0 = arith.constant 0 : i32
    return %arg1, %arg0, %c0_i32 : i32, i32, i32
  }
  func.func @transform_1(%arg0: i32, %arg1: i32) -> (i32, i32) {
    %c0_i32 = arith.constant 0 : i32
    %c0_i32_0 = arith.constant 0 : i32
    %c0_i32_1 = arith.constant 0 : i32
    return %c0_i32, %c0_i32_0 : i32, i32
  }
  func.func @transform_2(%arg0: i32, %arg1: i32) -> (i32, i32) {
    %c0_i32 = arith.constant 0 : i32
    %c0_i32_0 = arith.constant 0 : i32
    %c0_i32_1 = arith.constant 0 : i32
    return %c0_i32, %c0_i32_0 : i32, i32
  }
  func.func @transform_3(%arg0: i32, %arg1: i32) -> (i32, i32) {
    %c0_i32 = arith.constant 0 : i32
    %c0_i32_0 = arith.constant 0 : i32
    %c0_i32_1 = arith.constant 0 : i32
    return %c0_i32, %c0_i32_0 : i32, i32
  }
  func.func @transform_4(%arg0: i32, %arg1: i32) -> (i32, i32) {
    %c0_i32 = arith.constant 0 : i32
    %c0_i32_0 = arith.constant 0 : i32
    %c0_i32_1 = arith.constant 0 : i32
    return %c0_i32, %c0_i32_0 : i32, i32
  }
  func.func @transform_5(%arg0: i32, %arg1: i32) -> (i32, i32) {
    %c0_i32 = arith.constant 0 : i32
    %c0_i32_0 = arith.constant 0 : i32
    return %arg0, %c0_i32 : i32, i32
  }
  func.func @transform_6(%arg0: i32, %arg1: i32) -> (i32, i32) {
    %c0_i32 = arith.constant 0 : i32
    %c0_i32_0 = arith.constant 0 : i32
    return %arg0, %c0_i32 : i32, i32
  }
  func.func @transform_7(%arg0: i32, %arg1: i32) -> (i32, i32, i32) {
    %c0_i32 = arith.constant 0 : i32
    %c0_i32_0 = arith.constant 0 : i32
    return %arg1, %arg0, %c0_i32 : i32, i32, i32
  }
  func.func @transform_8(%arg0: i32, %arg1: i32) -> (i32, i32) {
    %c0_i32 = arith.constant 0 : i32
    %c0_i32_0 = arith.constant 0 : i32
    return %arg0, %c0_i32 : i32, i32
  }
}

</mosaic_0001>

<bundles_post_ra>
// kernel: _lstm_sequence_pallas.1
= control target key start
LH: loop header
LB: loop body
LE: loop exit
PB: predicated region body
PF: predicated region fallthrough
CT: control target
= control target key end

     0   :  { %14 = vsyncpa [#allocation4], 0  ;;  %s1537_s11 = smov 32   ;;  %v1538_v3 = vmov 0.0|0.0   ;;  %vm35_vm0 = vcmask 261120   ;;  %vm1539_vm1 = vmmov 0   ;;  %s1849_s0 = inlined_call_operand.vmem [shape: f32[8,8,16], index: 0, kind: input, shape index: {}]   ;;  %s1850_s1 = inlined_call_operand.vmem [shape: f32[48,128], index: 1, kind: input, shape index: {}]   ;;  %s1851_s2 = inlined_call_operand.vmem [shape: f32[1,128], index: 2, kind: input, shape index: {}]   ;;  %s1852_s3 = inlined_call_operand.vmem [shape: f32[1,128], index: 3, kind: input, shape index: {}]   ;;  %s1853_s4 = inlined_call_operand.vmem [shape: f32[1,128], index: 4, kind: input, shape index: {}]   ;;  %s1854_s5 = inlined_call_operand.vmem [shape: f32[8,32], index: 5, kind: input, shape index: {}]   ;;  %s1855_s6 = inlined_call_operand.vmem [shape: f32[8,32], index: 6, kind: input, shape index: {}]   ;;  %s1856_s7 = inlined_call_operand.hbm [shape: f32[8,8,32], index: 7, kind: output, shape index: {0}]   ;;  %s1857_s8 = inlined_call_operand.hbm [shape: f32[8,32], index: 8, kind: output, shape index: {1}]  }
   0x1   :  { %v40_v0 = vld [vmem:[%s1849_s0] sm:$0xff]  ;;  %v49_v2 = vld [vmem:[%s1850_s1 + $0x8] sm:$0xff]  ;;  %1375 = vmatprep.subr.bf16.mxu0 %v1538_v3  ;;  %v50_v6 = vld [vmem:[%s1850_s1 + $0x10] sm:$0xff]  ;;  %v1540_v8 = vmov 0.0   ;;  %1384 = vmatprep.subr.bf16.mxu1 %v1538_v3 }
   0x2   :  { %v48_v1 = vld [vmem:[%s1850_s1] sm:$0xff]  ;;  %42 = vrot.lane.b32.xlu0 %v40_v0, %s1537_s11  ;;  %v51_v7 = vld [vmem:[%s1850_s1 + $0x18] sm:$0xff]  ;;  %1267 = vmatprep.mubr.msk.f32.mxu0 %vm1539_vm1, %v1540_v8 }
   0x3   :  { %v1603_v4 = vpack.c.bf16 %v49_v2, %v48_v1  ;;  %v34_v5 = vld [vmem:[%s1854_s5] sm:$0xff]  ;;  %v1622_v10 = vpack.c.bf16 %v51_v7, %v50_v6 }
   0x4   :  { %36 = vst.msk [vmem:[#allocation2] sm:$0xff] %vm35_vm0, %v34_v5  ;;  %v37_v9 = vld [vmem:[%s1855_s6] sm:$0xff] }
   0x5   :  { %1377 = vmatpush3.bf16.msra.mxu0 %v1603_v4  ;;  %38 = vst.msk [vmem:[#allocation5] sm:$0xff] %vm35_vm0, %v37_v9  ;;  %1386 = vmatpush3.bf16.msra.mxu1 %v1603_v4 }
   0x6   :  { %15 = vsyncpa [#allocation6], 0  ;;  %1378 = vmatprep.subr.bf16.mxu0 %v1538_v3  ;;  %v52_v11 = vld [vmem:[%s1850_s1 + $0x20] sm:$0xff]  ;;  %v53_v12 = vld [vmem:[%s1850_s1 + $0x28] sm:$0xff]  ;;  %1387 = vmatprep.subr.bf16.mxu1 %v1538_v3  ;;  %vm45_vm2 = vcmask 392448   ;;  %vm61_vm3 = vcmask 392192  }
   0x7   :  { %1282 = vmatprep.mubr.msk.f32.mxu1 %vm1539_vm1, %v1540_v8  ;;  %v1637_v13 = vpack.c.bf16 %v53_v12, %v52_v11  ;;  %v1660_v17 = vld [vmem:[%s1851_s2] ss:$0 sm:$0xff]  ;;  %s1541_s2 = smov 64   ;;  %v1164_v33 = vld [vmem:[%s1849_s0 + $0x8] sm:$0xff]  ;;  %v1169_v51 = vld [vmem:[%s1849_s0 + $0x10] sm:$0xff]  ;;  %s1543_s18 = smov [#allocation5]  }
   0x8   :  { %v1666_v21 = vld [vmem:[%s1852_s3] ss:$0 sm:$0xff]  ;;  %v1174_v7 = vld [vmem:[%s1849_s0 + $0x18] sm:$0xff]  ;;  %s1148_s19 = sshll.u32 %s1543_s18, 4  ;;  %s1149_s19 = int_to_ptr.vmem [resolvable:$true] %s1148_s19 }
   0x9   :  { %1380 = vmatpush3.bf16.msra.mxu0 %v1622_v10  ;;  %1389 = vmatpush3.bf16.msra.mxu1 %v1622_v10  ;;  %v1671_v23 = vld [vmem:[%s1853_s4] ss:$0 sm:$0xff]  ;;  %s1489_s5 = scalar_lea.vmem %s1149_s19, 128  ;;  %p1494_p1 = scmp.lt.s32.totalorder %s1149_s19, %s1149_s19 }
   0xa   :  { %1381 = vmatprep.subr.bf16.mxu0 %v1538_v3  ;;  %1390 = vmatprep.subr.bf16.mxu1 %v1538_v3  ;;  %p1490_p0 = scmp.ne.s32.totalorder %s1149_s19, %s1489_s5  ;;  %p1495_p2 = scmp.lt.s32.totalorder %s1489_s5, %s1489_s5 }
   0xc   :  { %v39_v14 = vld [vmem:[#allocation5] sm:$0xff]  ;;  %p1496_p3 = por %p1495_p2, %p1494_p1 }
   0xd   :  { %1383 = vmatpush3.bf16.msra.mxu0 %v1637_v13  ;;  %153 = vrot.lane.b32.xlu1 %v39_v14, %s1537_s11 }
   0xe   :  { %1392 = vmatpush3.bf16.msra.mxu1 %v1637_v13  ;;  %1393 = vmatprep.subr.bf16.mxu0 %v1538_v3  ;;  %p1497_p4 = pnand %p1496_p3, %p1490_p0 }
   0xf   :  { %1402 = vmatprep.subr.bf16.mxu1 %v1538_v3 }
  0x74   :  { %v43_v15 = vpop.permute.xlu0 %42 }
  0x75   :  { %46 = vst.msk [vmem:[#allocation2] sm:$0xff] %vm45_vm2, %v43_v15 }
  0x7c   :  { %v47_v16 = vld [vmem:[#allocation2] sm:$0xff] }
  0x7d   :  { %1268 = vmatmul.mubr.msk.f32.vlgmr.msra.gmra.mrb[0].mxu0 %vm61_vm3, %v47_v16 }
  0x7e   :  { %1395 = vmatpush3.bf16.msra.mxu0 %v1603_v4  ;;  %1297 = vmatprep.mubr.msk.f32.mxu0 %vm1539_vm1, %v1540_v8 }
  0x7f   :  { %1396 = vmatprep.subr.bf16.mxu0 %v1538_v3  ;;  %v154_v28 = vpop.permute.xlu1 %153 }
  0x82   :  { %1398 = vmatpush3.bf16.msra.mxu0 %v1622_v10 }
  0x83   :  { %1399 = vmatprep.subr.bf16.mxu0 %v1538_v3 }
  0x86   :  { %1401 = vmatpush3.bf16.msra.mxu0 %v1637_v13 }
  0x87   :  { %1411 = vmatprep.subr.bf16.mxu0 %v1538_v3 }
 0x150   :  { %v131_v18 = vpop.f32.mrb[0].mxu0 }
 0x151   :  { %v132_v19 = vadd.f32 %v1660_v17, %v131_v18  ;;  %v1269_v20 = vpop.f32.mrb[1].mxu0 }
 0x153   :  { %1457 = vtanh.f32 %v132_v19 }
 0x15d   :  { %v1458_v22 = vpop.eup %1457 }
 0x15e   :  { %v143_v24 = vmul.f32 %v1458_v22, %v1666_v21 }
 0x160   :  { %v151_v25 = vadd.f32 %v1671_v23, %v143_v24 }
 0x162   :  { %158 = vrot.lane.b32.xlu0 %v151_v25, %s1541_s2  ;;  %v156_v29 = vmul.f32 %v154_v28, %v151_v25 }
 0x1d4   :  { %v159_v26 = vpop.permute.xlu0 %158 }
 0x1d5   :  { %v161_v27 = vmul.f32 %v159_v26, %v151_v25 }
 0x1d7   :  { %163 = vrot.lane.b32.xlu1 %v161_v27, %s1537_s11 }
 0x249   :  { %v164_v30 = vpop.permute.xlu1 %163 }
 0x24a   :  { %v166_v31 = vadd.f32 %v164_v30, %v156_v29 }
 0x24c   :  { %1459 = vtanh.f32 %v166_v31 }
 0x256   :  { %v1460_v32 = vpop.eup %1459 }
 0x257   :  { %169 = vrot.lane.b32.xlu0 %v1460_v32, %s1541_s2 }
 0x25b   :  { %183 = vrot.lane.b32.xlu0 %v1164_v33, %s1537_s11 }
 0x2c9   :  { %v170_v34 = vpop.permute.xlu0 %169 }
 0x2ca   :  { %v172_v35 = vmul.f32 %v170_v34, %v151_v25 }
 0x2cc   :  { %174 = vrot.lane.b32.xlu1 %v172_v35, %s1537_s11 }
 0x2cd   :  { %v184_v36 = vpop.permute.xlu0 %183 }
 0x33e   :  { %v175_v37 = vpop.permute.xlu1 %174 }
 0x33f   :  { %178 = vst.msk [vmem:[#allocation2] sm:$0xff] %vm35_vm0, %v175_v37  ;;  %179 = vst.msk [vmem:[#allocation3] sm:$0xff] %vm35_vm0, %v175_v37 }
 0x340   :  { %186 = vst.msk [vmem:[#allocation2] sm:$0xff] %vm45_vm2, %v184_v36 }
 0x347   :  { %v187_v38 = vld [vmem:[#allocation2] sm:$0xff] }
 0x348   :  { %1283 = vmatmul.mubr.msk.f32.vlgmr.msra.gmra.mrb[0].mxu1 %vm61_vm3, %v187_v38 }
 0x349   :  { %1404 = vmatpush3.bf16.msra.mxu1 %v1603_v4  ;;  %1312 = vmatprep.mubr.msk.f32.mxu1 %vm1539_vm1, %v1540_v8 }
 0x34a   :  { %1405 = vmatprep.subr.bf16.mxu1 %v1538_v3 }
 0x34d   :  { %1407 = vmatpush3.bf16.msra.mxu1 %v1622_v10 }
 0x34e   :  { %1408 = vmatprep.subr.bf16.mxu1 %v1538_v3 }
 0x351   :  { %1410 = vmatpush3.bf16.msra.mxu1 %v1637_v13 }
 0x352   :  { %1420 = vmatprep.subr.bf16.mxu1 %v1538_v3 }
 0x41b   :  { %v270_v39 = vpop.f32.mrb[0].mxu1 }
 0x41c   :  { %v271_v40 = vadd.f32 %v1660_v17, %v270_v39  ;;  %v1284_v41 = vpop.f32.mrb[1].mxu1 }
 0x41e   :  { %1461 = vtanh.f32 %v271_v40 }
 0x428   :  { %v1462_v42 = vpop.eup %1461 }
 0x429   :  { %v282_v43 = vmul.f32 %v1462_v42, %v1666_v21 }
 0x42b   :  { %v290_v44 = vadd.f32 %v1671_v23, %v282_v43 }
 0x42d   :  { %293 = vrot.lane.b32.xlu1 %v290_v44, %s1541_s2  ;;  %v291_v47 = vmul.f32 %v290_v44, %v166_v31  ;;  %v1179_v31 = vld [vmem:[%s1849_s0 + $0x20] sm:$0xff] }
 0x49f   :  { %v294_v45 = vpop.permute.xlu1 %293 }
 0x4a0   :  { %v296_v46 = vmul.f32 %v294_v45, %v290_v44 }
 0x4a2   :  { %298 = vrot.lane.b32.xlu0 %v296_v46, %s1537_s11 }
 0x514   :  { %v299_v48 = vpop.permute.xlu0 %298 }
 0x515   :  { %v301_v49 = vadd.f32 %v299_v48, %v291_v47 }
 0x517   :  { %1463 = vtanh.f32 %v301_v49 }
 0x521   :  { %v1464_v50 = vpop.eup %1463 }
 0x522   :  { %304 = vrot.lane.b32.xlu1 %v1464_v50, %s1541_s2 }
 0x526   :  { %318 = vrot.lane.b32.xlu1 %v1169_v51, %s1537_s11 }
 0x594   :  { %v305_v52 = vpop.permute.xlu1 %304 }
 0x595   :  { %v307_v53 = vmul.f32 %v305_v52, %v290_v44 }
 0x597   :  { %309 = vrot.lane.b32.xlu0 %v307_v53, %s1537_s11 }
 0x598   :  { %v319_v54 = vpop.permute.xlu1 %318 }
 0x609   :  { %v310_v55 = vpop.permute.xlu0 %309 }
 0x60a   :  { %312 = vst.msk [vmem:[#allocation2] sm:$0xff] %vm35_vm0, %v310_v55  ;;  %314 = vst.msk [vmem:[#allocation3 + $0x8] sm:$0xff] %vm35_vm0, %v310_v55 }
 0x60b   :  { %321 = vst.msk [vmem:[#allocation2] sm:$0xff] %vm45_vm2, %v319_v54 }
 0x612   :  { %v322_v56 = vld [vmem:[#allocation2] sm:$0xff] }
 0x613   :  { %1298 = vmatmul.mubr.msk.f32.vlgmr.msra.gmra.mrb[2].mxu0 %vm61_vm3, %v322_v56 }
 0x614   :  { %1413 = vmatpush3.bf16.msra.mxu0 %v1603_v4  ;;  %1327 = vmatprep.mubr.msk.f32.mxu0 %vm1539_vm1, %v1540_v8 }
 0x615   :  { %1414 = vmatprep.subr.bf16.mxu0 %v1538_v3 }
 0x618   :  { %1416 = vmatpush3.bf16.msra.mxu0 %v1622_v10 }
 0x619   :  { %1417 = vmatprep.subr.bf16.mxu0 %v1538_v3 }
 0x61c   :  { %1419 = vmatpush3.bf16.msra.mxu0 %v1637_v13 }
 0x61d   :  { %1429 = vmatprep.subr.bf16.mxu0 %v1538_v3 }
 0x6e6   :  { %v405_v57 = vpop.f32.mrb[2].mxu0 }
 0x6e7   :  { %v406_v58 = vadd.f32 %v1660_v17, %v405_v57  ;;  %v1299_v59 = vpop.f32.mrb[3].mxu0 }
 0x6e9   :  { %1465 = vtanh.f32 %v406_v58 }
 0x6f3   :  { %v1466_v60 = vpop.eup %1465 }
 0x6f4   :  { %v417_v61 = vmul.f32 %v1466_v60, %v1666_v21 }
 0x6f6   :  { %v425_v62 = vadd.f32 %v1671_v23, %v417_v61 }
 0x6f8   :  { %428 = vrot.lane.b32.xlu0 %v425_v62, %s1541_s2  ;;  %v426_v1 = vmul.f32 %v425_v62, %v301_v49  ;;  %v1184_v49 = vld [vmem:[%s1849_s0 + $0x28] sm:$0xff] }
 0x76a   :  { %v429_v63 = vpop.permute.xlu0 %428 }
 0x76b   :  { %v431_v0 = vmul.f32 %v429_v63, %v425_v62 }
 0x76d   :  { %433 = vrot.lane.b32.xlu1 %v431_v0, %s1537_s11 }
 0x7df   :  { %v434_v2 = vpop.permute.xlu1 %433 }
 0x7e0   :  { %v436_v5 = vadd.f32 %v434_v2, %v426_v1 }
 0x7e2   :  { %1467 = vtanh.f32 %v436_v5 }
 0x7ec   :  { %v1468_v6 = vpop.eup %1467 }
 0x7ed   :  { %439 = vrot.lane.b32.xlu0 %v1468_v6, %s1541_s2 }
 0x7f1   :  { %453 = vrot.lane.b32.xlu0 %v1174_v7, %s1537_s11 }
 0x85f   :  { %v440_v9 = vpop.permute.xlu0 %439 }
 0x860   :  { %v442_v11 = vmul.f32 %v440_v9, %v425_v62  ;;  %v1189_v62 = vld [vmem:[%s1849_s0 + $0x30] sm:$0xff] }
 0x862   :  { %444 = vrot.lane.b32.xlu1 %v442_v11, %s1537_s11 }
 0x863   :  { %v454_v12 = vpop.permute.xlu0 %453 }
 0x8d4   :  { %v445_v14 = vpop.permute.xlu1 %444 }
 0x8d5   :  { %447 = vst.msk [vmem:[#allocation2] sm:$0xff] %vm35_vm0, %v445_v14  ;;  %449 = vst.msk [vmem:[#allocation3 + $0x10] sm:$0xff] %vm35_vm0, %v445_v14 }
 0x8d6   :  { %456 = vst.msk [vmem:[#allocation2] sm:$0xff] %vm45_vm2, %v454_v12 }
 0x8dd   :  { %v457_v15 = vld [vmem:[#allocation2] sm:$0xff] }
 0x8de   :  { %1313 = vmatmul.mubr.msk.f32.vlgmr.msra.gmra.mrb[2].mxu1 %vm61_vm3, %v457_v15 }
 0x8df   :  { %1422 = vmatpush3.bf16.msra.mxu1 %v1603_v4  ;;  %1342 = vmatprep.mubr.msk.f32.mxu1 %vm1539_vm1, %v1540_v8 }
 0x8e0   :  { %1423 = vmatprep.subr.bf16.mxu1 %v1538_v3 }
 0x8e3   :  { %1425 = vmatpush3.bf16.msra.mxu1 %v1622_v10 }
 0x8e4   :  { %1426 = vmatprep.subr.bf16.mxu1 %v1538_v3 }
 0x8e7   :  { %1428 = vmatpush3.bf16.msra.mxu1 %v1637_v13 }
 0x8e8   :  { %1438 = vmatprep.subr.bf16.mxu1 %v1538_v3 }
 0x9b1   :  { %v540_v16 = vpop.f32.mrb[2].mxu1 }
 0x9b2   :  { %v541_v18 = vadd.f32 %v1660_v17, %v540_v16  ;;  %v1314_v19 = vpop.f32.mrb[3].mxu1 }
 0x9b4   :  { %1469 = vtanh.f32 %v541_v18 }
 0x9be   :  { %v1470_v20 = vpop.eup %1469 }
 0x9bf   :  { %v552_v22 = vmul.f32 %v1470_v20, %v1666_v21 }
 0x9c1   :  { %v560_v24 = vadd.f32 %v1671_v23, %v552_v22 }
 0x9c3   :  { %563 = vrot.lane.b32.xlu1 %v560_v24, %s1541_s2  ;;  %v561_v27 = vmul.f32 %v560_v24, %v436_v5 }
 0xa35   :  { %v564_v25 = vpop.permute.xlu1 %563 }
 0xa36   :  { %v566_v26 = vmul.f32 %v564_v25, %v560_v24 }
 0xa38   :  { %568 = vrot.lane.b32.xlu0 %v566_v26, %s1537_s11 }
 0xaaa   :  { %v569_v28 = vpop.permute.xlu0 %568 }
 0xaab   :  { %v571_v29 = vadd.f32 %v569_v28, %v561_v27 }
 0xaad   :  { %1471 = vtanh.f32 %v571_v29 }
 0xab7   :  { %v1472_v30 = vpop.eup %1471 }
 0xab8   :  { %574 = vrot.lane.b32.xlu1 %v1472_v30, %s1541_s2 }
 0xabc   :  { %588 = vrot.lane.b32.xlu1 %v1179_v31, %s1537_s11 }
 0xb2a   :  { %v575_v32 = vpop.permute.xlu1 %574 }
 0xb2b   :  { %v577_v33 = vmul.f32 %v575_v32, %v560_v24  ;;  %v1194_v24 = vld [vmem:[%s1849_s0 + $0x38] sm:$0xff]  ;;  %s1542_s0 = smov 96  }
 0xb2d   :  { %579 = vrot.lane.b32.xlu0 %v577_v33, %s1537_s11 }
 0xb2e   :  { %v589_v34 = vpop.permute.xlu1 %588 }
 0xb9f   :  { %v580_v35 = vpop.permute.xlu0 %579 }
 0xba0   :  { %582 = vst.msk [vmem:[#allocation2] sm:$0xff] %vm35_vm0, %v580_v35  ;;  %584 = vst.msk [vmem:[#allocation3 + $0x18] sm:$0xff] %vm35_vm0, %v580_v35 }
 0xba1   :  { %591 = vst.msk [vmem:[#allocation2] sm:$0xff] %vm45_vm2, %v589_v34 }
 0xba8   :  { %v592_v36 = vld [vmem:[#allocation2] sm:$0xff] }
 0xba9   :  { %1328 = vmatmul.mubr.msk.f32.vlgmr.msra.gmra.mrb[4].mxu0 %vm61_vm3, %v592_v36 }
 0xbaa   :  { %1431 = vmatpush3.bf16.msra.mxu0 %v1603_v4  ;;  %1357 = vmatprep.mubr.msk.f32.mxu0 %vm1539_vm1, %v1540_v8 }
 0xbab   :  { %1432 = vmatprep.subr.bf16.mxu0 %v1538_v3 }
 0xbae   :  { %1434 = vmatpush3.bf16.msra.mxu0 %v1622_v10 }
 0xbaf   :  { %1435 = vmatprep.subr.bf16.mxu0 %v1538_v3 }
 0xbb2   :  { %1437 = vmatpush3.bf16.msra.mxu0 %v1637_v13 }
 0xc7c   :  { %v675_v37 = vpop.f32.mrb[4].mxu0 }
 0xc7d   :  { %v676_v38 = vadd.f32 %v1660_v17, %v675_v37  ;;  %v1329_v39 = vpop.f32.mrb[5].mxu0 }
 0xc7f   :  { %1473 = vtanh.f32 %v676_v38 }
 0xc89   :  { %v1474_v40 = vpop.eup %1473 }
 0xc8a   :  { %v687_v41 = vmul.f32 %v1474_v40, %v1666_v21 }
 0xc8c   :  { %v695_v42 = vadd.f32 %v1671_v23, %v687_v41 }
 0xc8e   :  { %698 = vrot.lane.b32.xlu0 %v695_v42, %s1541_s2  ;;  %v696_v45 = vmul.f32 %v695_v42, %v571_v29 }
 0xd00   :  { %v699_v43 = vpop.permute.xlu0 %698 }
 0xd01   :  { %v701_v44 = vmul.f32 %v699_v43, %v695_v42 }
 0xd03   :  { %703 = vrot.lane.b32.xlu1 %v701_v44, %s1537_s11 }
 0xd75   :  { %v704_v46 = vpop.permute.xlu1 %703 }
 0xd76   :  { %v706_v47 = vadd.f32 %v704_v46, %v696_v45 }
 0xd78   :  { %1475 = vtanh.f32 %v706_v47 }
 0xd82   :  { %v1476_v48 = vpop.eup %1475 }
 0xd83   :  { %709 = vrot.lane.b32.xlu0 %v1476_v48, %s1541_s2 }
 0xd87   :  { %723 = vrot.lane.b32.xlu0 %v1184_v49, %s1537_s11 }
 0xdf5   :  { %v710_v50 = vpop.permute.xlu0 %709 }
 0xdf6   :  { %v712_v51 = vmul.f32 %v710_v50, %v695_v42 }
 0xdf8   :  { %714 = vrot.lane.b32.xlu1 %v712_v51, %s1537_s11 }
 0xdf9   :  { %v724_v52 = vpop.permute.xlu0 %723 }
 0xe6a   :  { %v715_v53 = vpop.permute.xlu1 %714 }
 0xe6b   :  { %717 = vst.msk [vmem:[#allocation2] sm:$0xff] %vm35_vm0, %v715_v53  ;;  %719 = vst.msk [vmem:[#allocation3 + $0x20] sm:$0xff] %vm35_vm0, %v715_v53 }
 0xe6c   :  { %726 = vst.msk [vmem:[#allocation2] sm:$0xff] %vm45_vm2, %v724_v52 }
 0xe73   :  { %v727_v54 = vld [vmem:[#allocation2] sm:$0xff] }
 0xe74   :  { %1343 = vmatmul.mubr.msk.f32.vlgmr.msra.gmra.mrb[4].mxu1 %vm61_vm3, %v727_v54 }
 0xe75   :  { %1440 = vmatpush3.bf16.msra.mxu1 %v1603_v4  ;;  %1372 = vmatprep.mubr.msk.f32.mxu1 %vm1539_vm1, %v1540_v8 }
 0xe76   :  { %1441 = vmatprep.subr.bf16.mxu1 %v1538_v3 }
 0xe79   :  { %1443 = vmatpush3.bf16.msra.mxu1 %v1622_v10 }
 0xe7a   :  { %1444 = vmatprep.subr.bf16.mxu1 %v1538_v3 }
 0xe7d   :  { %1446 = vmatpush3.bf16.msra.mxu1 %v1637_v13 }
 0xf47   :  { %v810_v55 = vpop.f32.mrb[4].mxu1 }
 0xf48   :  { %v811_v56 = vadd.f32 %v1660_v17, %v810_v55  ;;  %v1344_v57 = vpop.f32.mrb[5].mxu1 }
 0xf4a   :  { %1477 = vtanh.f32 %v811_v56 }
 0xf54   :  { %v1478_v58 = vpop.eup %1477 }
 0xf55   :  { %v822_v59 = vmul.f32 %v1478_v58, %v1666_v21 }
 0xf57   :  { %v830_v4 = vadd.f32 %v1671_v23, %v822_v59 }
 0xf59   :  { %833 = vrot.lane.b32.xlu1 %v830_v4, %s1541_s2  ;;  %v831_v10 = vmul.f32 %v830_v4, %v706_v47 }
 0xfcb   :  { %v834_v8 = vpop.permute.xlu1 %833 }
 0xfcc   :  { %v836_v60 = vmul.f32 %v834_v8, %v830_v4 }
 0xfce   :  { %838 = vrot.lane.b32.xlu0 %v836_v60, %s1537_s11 }
0x1040   :  { %v839_v3 = vpop.permute.xlu0 %838 }
0x1041   :  { %v841_v61 = vadd.f32 %v839_v3, %v831_v10 }
0x1043   :  { %1479 = vtanh.f32 %v841_v61 }
0x104d   :  { %v1480_v13 = vpop.eup %1479 }
0x104e   :  { %844 = vrot.lane.b32.xlu1 %v1480_v13, %s1541_s2 }
0x1052   :  { %858 = vrot.lane.b32.xlu1 %v1189_v62, %s1537_s11 }
0x10c0   :  { %v845_v63 = vpop.permute.xlu1 %844 }
0x10c1   :  { %v847_v0 = vmul.f32 %v845_v63, %v830_v4 }
0x10c3   :  { %849 = vrot.lane.b32.xlu0 %v847_v0, %s1537_s11 }
0x10c4   :  { %v859_v1 = vpop.permute.xlu1 %858 }
0x1135   :  { %v850_v2 = vpop.permute.xlu0 %849 }
0x1136   :  { %852 = vst.msk [vmem:[#allocation2] sm:$0xff] %vm35_vm0, %v850_v2  ;;  %854 = vst.msk [vmem:[#allocation3 + $0x28] sm:$0xff] %vm35_vm0, %v850_v2 }
0x1137   :  { %861 = vst.msk [vmem:[#allocation2] sm:$0xff] %vm45_vm2, %v859_v1 }
0x113e   :  { %v862_v5 = vld [vmem:[#allocation2] sm:$0xff] }
0x113f   :  { %1358 = vmatmul.mubr.msk.f32.vlgmr.msra.gmra.mrb[6].mxu0 %vm61_vm3, %v862_v5 }
0x1212   :  { %v945_v6 = vpop.f32.mrb[6].mxu0 }
0x1213   :  { %v946_v7 = vadd.f32 %v1660_v17, %v945_v6  ;;  %v1359_v9 = vpop.f32.mrb[7].mxu0 }
0x1215   :  { %1481 = vtanh.f32 %v946_v7 }
0x121f   :  { %v1482_v11 = vpop.eup %1481 }
0x1220   :  { %v957_v12 = vmul.f32 %v1482_v11, %v1666_v21 }
0x1222   :  { %v965_v14 = vadd.f32 %v1671_v23, %v957_v12 }
0x1224   :  { %968 = vrot.lane.b32.xlu0 %v965_v14, %s1541_s2  ;;  %v966_v18 = vmul.f32 %v965_v14, %v841_v61 }
0x1296   :  { %v969_v15 = vpop.permute.xlu0 %968 }
0x1297   :  { %v971_v16 = vmul.f32 %v969_v15, %v965_v14 }
0x1299   :  { %973 = vrot.lane.b32.xlu1 %v971_v16, %s1537_s11 }
0x130b   :  { %v974_v19 = vpop.permute.xlu1 %973 }
0x130c   :  { %v976_v20 = vadd.f32 %v974_v19, %v966_v18 }
0x130e   :  { %1483 = vtanh.f32 %v976_v20 }
0x1318   :  { %v1484_v22 = vpop.eup %1483 }
0x1319   :  { %979 = vrot.lane.b32.xlu0 %v1484_v22, %s1541_s2 }
0x131d   :  { %993 = vrot.lane.b32.xlu0 %v1194_v24, %s1537_s11 }
0x138b   :  { %v980_v25 = vpop.permute.xlu0 %979 }
0x138c   :  { %v982_v26 = vmul.f32 %v980_v25, %v965_v14 }
0x138e   :  { %984 = vrot.lane.b32.xlu1 %v982_v26, %s1537_s11 }
0x138f   :  { %v994_v27 = vpop.permute.xlu0 %993 }
0x1400   :  { %v985_v28 = vpop.permute.xlu1 %984 }
0x1401   :  { %987 = vst.msk [vmem:[#allocation2] sm:$0xff] %vm35_vm0, %v985_v28  ;;  %989 = vst.msk [vmem:[#allocation3 + $0x30] sm:$0xff] %vm35_vm0, %v985_v28 }
0x1402   :  { %996 = vst.msk [vmem:[#allocation2] sm:$0xff] %vm45_vm2, %v994_v27 }
0x1409   :  { %v997_v29 = vld [vmem:[#allocation2] sm:$0xff] }
0x140a   :  { %1373 = vmatmul.mubr.msk.f32.vlgmr.msra.gmra.mrb[6].mxu1 %vm61_vm3, %v997_v29 }
0x14dd   :  { %v1080_v30 = vpop.f32.mrb[6].mxu1 }
0x14de   :  { %v1081_v31 = vadd.f32 %v1660_v17, %v1080_v30  ;;  %v1374_v32 = vpop.f32.mrb[7].mxu1 }
0x14e0   :  { %1485 = vtanh.f32 %v1081_v31 }
0x14ea   :  { %v1486_v33 = vpop.eup %1485 }
0x14eb   :  { %v1092_v34 = vmul.f32 %v1486_v33, %v1666_v21 }
0x14ed   :  { %v1100_v35 = vadd.f32 %v1671_v23, %v1092_v34 }
0x14ef   :  { %1103 = vrot.lane.b32.xlu1 %v1100_v35, %s1541_s2  ;;  %v1101_v38 = vmul.f32 %v1100_v35, %v976_v20 }
0x1561   :  { %v1104_v36 = vpop.permute.xlu1 %1103 }
0x1562   :  { %v1106_v37 = vmul.f32 %v1104_v36, %v1100_v35 }
0x1564   :  { %1108 = vrot.lane.b32.xlu0 %v1106_v37, %s1537_s11 }
0x15d6   :  { %v1109_v39 = vpop.permute.xlu0 %1108 }
0x15d7   :  { %v1111_v40 = vadd.f32 %v1109_v39, %v1101_v38 }
0x15d9   :  { %1487 = vtanh.f32 %v1111_v40 }
0x15e3   :  { %v1488_v41 = vpop.eup %1487 }
0x15e4   :  { %1114 = vrot.lane.b32.xlu1 %v1488_v41, %s1541_s2 }
0x15e8   :  { %1126 = vrot.lane.b32.xlu1 %v1111_v40, %s1542_s0 }
0x1656   :  { %v1115_v17 = vpop.permute.xlu1 %1114 }
0x1657   :  { %v1117_v21 = vmul.f32 %v1115_v17, %v1100_v35 }
0x1659   :  { %1119 = vrot.lane.b32.xlu0 %v1117_v21, %s1537_s11 }
0x165a   :  { %v1127_v23 = vpop.permute.xlu1 %1126 }
0x165b   :  { %1129 = vst.msk [vmem:[#allocation5] sm:$0xff] %vm35_vm0, %v1127_v23 }
0x165c   :  { %1500 = shalt.err (!%p1497_p4)
}
0x165d   :  { %s1501_s22 = scalar_lea.hbm %s1857_s8, 128 }
0x165e   :  { %p1502_p5 = scmp.ne.s32.totalorder %s1857_s8, %s1501_s22  ;;  %p1505_p6 = scmp.lt.u32.totalorder %s1501_s22, %s1857_s8 }
0x1660   :  { %p1507_p7 = pnand %p1505_p6, %p1502_p5 }
0x1662   :  { %1510 = shalt.err (!%p1507_p7)
}
0x1663   :  { %1151 = dma.vmem_to_hbm [thread:$0]  %s1149_s19, 128, %s1857_s8, [#allocation6]  }
0x1664   :  { %s1544_s26 = smov [#allocation3]  }
0x1665   :  { %s1135_s2 = sshll.u32 %s1544_s26, 4  ;;  %s1136_s2 = int_to_ptr.vmem [resolvable:$true] %s1135_s2 }
0x1666   :  { %s1511_s3 = scalar_lea.vmem %s1136_s2, 1024  ;;  %p1516_p9 = scmp.lt.s32.totalorder %s1136_s2, %s1136_s2 }
0x1667   :  { %p1512_p8 = scmp.ne.s32.totalorder %s1136_s2, %s1511_s3  ;;  %p1517_p10 = scmp.lt.s32.totalorder %s1511_s3, %s1511_s3 }
0x1669   :  { %p1518_p11 = por %p1517_p10, %p1516_p9 }
0x166b   :  { %p1519_p12 = pnand %p1518_p11, %p1512_p8 }
0x16cb   :  { %v1120_v42 = vpop.permute.xlu0 %1119 }
0x16cc   :  { %1122 = vst.msk [vmem:[#allocation2] sm:$0xff] %vm35_vm0, %v1120_v42  ;;  %1124 = vst.msk [vmem:[#allocation3 + $0x38] sm:$0xff] %vm35_vm0, %v1120_v42 }
0x16cd   :  { %1522 = shalt.err (!%p1519_p12)
}
0x16ce   :  { %s1523_s28 = scalar_lea.hbm %s1856_s7, 1024 }
0x16cf   :  { %p1524_p13 = scmp.ne.s32.totalorder %s1856_s7, %s1523_s28  ;;  %p1527_p0 = scmp.lt.u32.totalorder %s1523_s28, %s1856_s7 }
0x16d1   :  { %p1529_p1 = pnand %p1527_p0, %p1524_p13 }
0x16d3   :  { %1532 = shalt.err (!%p1529_p1)
}
0x16d4   :  { %s1545_s10 = smov 128   ;;  %s1546_s12 = smov 8  }
0x16d5   :  { %1141 = dma.vmem_to_hbm [thread:$0]  %s1136_s2, 1024, %s1856_s7, [#allocation4], %s1545_s10, %s1545_s10, %s1546_s12  }
0x16d6   :  { %1533 = dma.done.wait [#allocation4], 1024  }
0x16d7   :  { %1534 = vsyncadd [#allocation4], 4294966272 }
0x16d8   :  { %1535 = dma.done.wait [#allocation6], 128  }
0x16d9   :  { %1536 = vsyncadd [#allocation6], 4294967168 }
0x16da   :  { %1158 = vsyncpa [#allocation4], 1 }
0x16db   :  { %1159 = vsyncpa [#allocation6], 1 }

</bundles_post_ra>
